<compile_context>
chip_gen: v5e
topology: v5e:2x2
jax: 0.10.0
libtpu: 0.0.40
codegen_flags: <defaults>
</compile_context>

<pallas_src>
import functools

import jax
import jax.numpy as jnp
from jax.experimental import pallas as pl
from jax.experimental.pallas import tpu as pltpu

F = 128                      # lane width; every feature dim is padded to this
NUM_W_BLOCKS = 8             # enc1, enc2, enc3, fused-heads, dec1, dec2, dec3, dec4
TILE_BATCH_MAX = 1024        # max batch-tile rows (review: 1024-2048; VMEM-safe)


def _cdiv(a, b):
    return (a + b - 1) // b


def _round_up(a, m):
    return _cdiv(a, m) * m


# --------------------------------------------------------------------------- #
# Kernel
# --------------------------------------------------------------------------- #
def vae_kernel(w_ref, b_ref, x_ref, eps_ref, out_ref, *, latent):
    """One batch tile of the full VAE forward.

    w_ref   : (8*128, 128) bf16 packed weights (resident across grid steps)
    b_ref   : (8, 128)     f32 packed biases   (resident across grid steps)
    x_ref   : (tb, input_size) f32 input (unpadded lanes)
    eps_ref : (tb, 2*latent)   f32 noise, nonzero only in lanes [latent:2*latent)
    out_ref : (tb, 128) f32: lanes [0:L)=mu, [L:2L)=log_std, [2L:2L+in)=recon
    """

    def w_block(i, k_rows=F):            # static, tile-aligned weight slice (bf16)
        return w_ref[pl.ds(i * F, k_rows), :]

    def bias(i):                          # (1, 128) f32 bias row
        return b_ref[pl.ds(i, 1), :]

    def linear(h, i, k_rows=F):           # bf16 MXU operands, f32 accumulate + bias
        return (jnp.dot(h.astype(jnp.bfloat16), w_block(i, k_rows),
                        preferred_element_type=jnp.float32) + bias(i))

    x = x_ref[...]                                        # (tb, input_size) f32

    # ---- encoder: (Linear -> Tanh) x3 ----
    h = jnp.tanh(linear(x, 0, x.shape[1]))                # K = input_size only
    h = jnp.tanh(linear(h, 1))
    h = jnp.tanh(linear(h, 2))

    # ---- fused heads: lanes [0:L)=mu, [L:2L)=log_std, lanes >= 2L exactly 0 ----
    heads = linear(h, 3)

    # ---- reparametrize: z = mu + eps * exp(log_std), lane-aligned, NaN-safe ----
    lane = jax.lax.broadcasted_iota(jnp.int32, heads.shape, 1)
    mu_only = jnp.where(lane < latent, heads, 0.0)
    log_std_only = jnp.where(
        jnp.logical_and(lane >= latent, lane < 2 * latent), heads, 0.0)

    # eps arrives narrow (2L lanes) with noise in [L:2L); widen with zeros.
    eps = jnp.pad(eps_ref[...], ((0, 0), (0, F - 2 * latent)))
    z = mu_only + eps * jnp.exp(log_std_only)

    # ---- decoder: (Linear -> Tanh) x3 -> Linear ----
    # w_block(4) has rows [0:L) and [L:2L) both set to the real decoder[0] weight,
    # so both the mu-lanes and the (eps*std)-lanes of z contribute correctly.
    d = jnp.tanh(linear(z, 4))
    d = jnp.tanh(linear(d, 5))
    d = jnp.tanh(linear(d, 6))
    recon = linear(d, 7)          # columns shifted: nonzero only in [2L:2L+input)

    # ---- single lane-dense (tb, 128) output slab: disjoint nonzero lanes ----
    out_ref[...] = recon + heads


# --------------------------------------------------------------------------- #
# Parameter construction / packing (host side, plain JAX)
# --------------------------------------------------------------------------- #
def make_params(key, input_size, latent_size):
    """Mimics PyTorch default Linear init; weights stored (in, out), biases (1, out)."""
    neuron_list = [10, 20, 10]
    dims = [
        (input_size, neuron_list[0]),      # encoder[0]
        (neuron_list[0], neuron_list[1]),  # encoder[2]
        (neuron_list[1], neuron_list[2]),  # encoder[4]
        (neuron_list[2], latent_size),     # encoder_mean
        (neuron_list[2], latent_size),     # encoder_log_std
        (latent_size, neuron_list[2]),     # decoder[0]
        (neuron_list[2], neuron_list[1]),  # decoder[2]
        (neuron_list[1], neuron_list[0]),  # decoder[4]
        (neuron_list[0], input_size),      # decoder[6]
    ]
    params = []
    for (fan_in, fan_out) in dims:
        key, kw, kb = jax.random.split(key, 3)
        bound = 1.0 / jnp.sqrt(jnp.float32(fan_in))
        w = jax.random.uniform(kw, (fan_in, fan_out), jnp.float32, -bound, bound)
        b = jax.random.uniform(kb, (1, fan_out), jnp.float32, -bound, bound)
        params.append((w, b))
    return params


def pack_params(params, input_size, latent_size):
    """Pack weights into a bf16 (8*128, 128) slab and biases into an f32 (8, 128) slab."""
    L = latent_size
    assert input_size <= F and 2 * L + input_size <= F, (
        "feature dims too large for single-lane-slab packing")
    # TODO(synk): K-tile the slab if input_size / hidden dims ever exceed 128.

    def pad_w(w):
        fi, fo = w.shape
        return jnp.zeros((F, F), jnp.float32).at[:fi, :fo].set(w)

    def pad_b(b, offset=0):
        b = b.reshape(-1)
        return jnp.zeros((1, F), jnp.float32).at[0, offset:offset + b.shape[0]].set(b)

    (w1, b1), (w2, b2), (w3, b3), (wm, bm), (ws, bs), \
        (wd1, bd1), (wd2, bd2), (wd3, bd3), (wd4, bd4) = params

    # fused encoder heads: mu in lanes [0:L), log_std in lanes [L:2L)
    wh = (jnp.zeros((F, F), jnp.float32)
          .at[:wm.shape[0], :L].set(wm)
          .at[:ws.shape[0], L:2 * L].set(ws))
    bh = (jnp.zeros((1, F), jnp.float32)
          .at[0, :L].set(bm.reshape(-1))
          .at[0, L:2 * L].set(bs.reshape(-1)))

    # decoder[0]: duplicate real rows into [L:2L) for the (eps*std) lanes of z
    wd1p = (jnp.zeros((F, F), jnp.float32)
            .at[:L, :wd1.shape[1]].set(wd1)
            .at[L:2 * L, :wd1.shape[1]].set(wd1))

    # decoder[6]: shift output columns by 2L so recon lands in lanes [2L:2L+input)
    wd4p = (jnp.zeros((F, F), jnp.float32)
            .at[:wd4.shape[0], 2 * L:2 * L + input_size].set(wd4))
    bd4p = pad_b(bd4, offset=2 * L)

    w_slab = jnp.concatenate(
        [pad_w(w1), pad_w(w2), pad_w(w3), wh, wd1p, pad_w(wd2), pad_w(wd3), wd4p],
        axis=0)
    b_slab = jnp.concatenate(
        [pad_b(b1), pad_b(b2), pad_b(b3), bh, pad_b(bd1), pad_b(bd2), pad_b(bd3), bd4p],
        axis=0)
    assert w_slab.shape == (NUM_W_BLOCKS * F, F) and b_slab.shape == (8, F)
    return w_slab.astype(jnp.bfloat16), b_slab


# --------------------------------------------------------------------------- #
# Wrapper
# --------------------------------------------------------------------------- #
@functools.partial(jax.jit, static_argnames=("input_size", "latent_size"))
def vae_forward(x, eps, w_slab, b_slab, *, input_size, latent_size):
    batch = x.shape[0]
    L = latent_size
    b8 = _round_up(batch, 8)

    # >= 2 grid steps whenever possible (v7x megacore), tiles capped at
    # TILE_BATCH_MAX rows, padding waste kept below 8 rows per step.
    min_steps = 2 if b8 >= 16 else 1
    n_steps = max(min_steps, _cdiv(b8, TILE_BATCH_MAX))
    tb = _round_up(_cdiv(b8, n_steps), 8)
    b_pad = tb * n_steps

    # Narrow (lane-thin) padded inputs; eps is pre-placed in lanes [L:2L) so it
    # aligns with log_std in the fused heads after the in-kernel widening pad.
    x_p = jnp.zeros((b_pad, input_size), jnp.float32).at[:batch].set(x)
    eps_p = jnp.zeros((b_pad, 2 * L), jnp.float32).at[:batch, L:2 * L].set(eps)

    kernel = functools.partial(vae_kernel, latent=L)

    out = pl.pallas_call(
        kernel,
        out_shape=jax.ShapeDtypeStruct((b_pad, F), jnp.float32),
        grid=(n_steps,),
        in_specs=[
            pl.BlockSpec((NUM_W_BLOCKS * F, F), lambda i: (0, 0)),  # bf16 weights, resident
            pl.BlockSpec((8, F), lambda i: (0, 0)),                 # f32 biases, resident
            pl.BlockSpec((tb, input_size), lambda i: (i, 0)),       # x tile (thin lanes)
            pl.BlockSpec((tb, 2 * L), lambda i: (i, 0)),            # eps tile (thin lanes)
        ],
        out_specs=pl.BlockSpec((tb, F), lambda i: (i, 0)),           # fused output slab
        compiler_params=pltpu.CompilerParams(
            dimension_semantics=("parallel",)),                      # megacore on v7x
    )(w_slab, b_slab, x_p, eps_p)

    mu = out[:batch, :L]
    log_std = out[:batch, L:2 * L]
    recon = out[:batch, 2 * L:2 * L + input_size]
    return recon, mu, log_std


# --------------------------------------------------------------------------- #
# Plain-JAX references
# --------------------------------------------------------------------------- #
def vae_forward_ref(x, eps, params, matmul_dtype=jnp.float32):
    """matmul_dtype=bf16 mirrors the kernel numerics (bf16 operands, f32 accumulate,
    f32 elementwise, mu and eps*std rounded separately before decoder[0])."""

    def lin(h, w, b):
        return (jnp.dot(h.astype(matmul_dtype), w.astype(matmul_dtype),
                        preferred_element_type=jnp.float32) + b.reshape(1, -1))

    h = x
    for (w, b) in params[0:3]:
        h = jnp.tanh(lin(h, w, b))
    mu = lin(h, *params[3])
    log_std = lin(h, *params[4])
    std = jnp.exp(log_std)
    wd1, bd1 = params[5]
    d = jnp.tanh(lin(mu, wd1, bd1) + lin(eps * std, wd1, jnp.zeros_like(bd1)))
    for (w, b) in params[6:8]:
        d = jnp.tanh(lin(d, w, b))
    recon = lin(d, *params[8])
    return recon, mu, log_std


if __name__ == "__main__":
    input_size = 16
    latent_size = 4

    root = jax.random.PRNGKey(0)
    k_params, k_x1, k_eps1, k_x2, k_eps2 = jax.random.split(root, 5)

    params = make_params(k_params, input_size, latent_size)
    w_slab, b_slab = pack_params(params, input_size, latent_size)

    # Two batch sizes: tiny single-tile case, and a non-multiple-of-8 case that
    # exercises row padding and the 2-step parallel grid.
    for batch, kx, ke in [(8, k_x1, k_eps1), (50, k_x2, k_eps2)]:
        x = jax.random.normal(kx, (batch, input_size), jnp.float32)
        # torch.randn_like equivalent noise, generated host-side (RNG stream differs).
        eps = jax.random.normal(ke, (batch, latent_size), jnp.float32)

        recon, mu, log_std = vae_forward(
            x, eps, w_slab, b_slab, input_size=input_size, latent_size=latent_size)
        jax.block_until_ready((recon, mu, log_std))

        # Tight check vs a reference that mirrors the kernel's bf16-MXU numerics.
        r_bf, mu_bf, ls_bf = vae_forward_ref(x, eps, params, matmul_dtype=jnp.bfloat16)
        assert jnp.allclose(recon, r_bf, atol=1e-3, rtol=1e-3), "recon mismatch (bf16 ref)"
        assert jnp.allclose(mu, mu_bf, atol=1e-3, rtol=1e-3), "mu mismatch (bf16 ref)"
        assert jnp.allclose(log_std, ls_bf, atol=1e-3, rtol=1e-3), "log_std mismatch (bf16 ref)"

        # Loose semantic check vs the full-f32 (PyTorch-semantics) reference.
        r32, mu32, ls32 = vae_forward_ref(x, eps, params, matmul_dtype=jnp.float32)
        assert jnp.allclose(recon, r32, atol=0.15, rtol=0.15), "recon mismatch (f32 ref)"
        assert jnp.allclose(mu, mu32, atol=0.15, rtol=0.15), "mu mismatch (f32 ref)"
        assert jnp.allclose(log_std, ls32, atol=0.15, rtol=0.15), "log_std mismatch (f32 ref)"

    print("KERNEL_OK")
</pallas_src>

<mosaic_0001>
module attributes {stable_mosaic.version = 11 : i64} {
  func.func @vae_kernel(%arg0: i32, %arg1: memref<1024x128xbf16, #tpu.memory_space<vmem>>, %arg2: memref<8x128xf32, #tpu.memory_space<vmem>>, %arg3: memref<8x16xf32, #tpu.memory_space<vmem>>, %arg4: memref<8x8xf32, #tpu.memory_space<vmem>>, %arg5: memref<8x128xf32, #tpu.memory_space<vmem>>) attributes {dimension_semantics = [#tpu.dimension_semantics<parallel>], iteration_bounds = array<i64: 1>, scalar_prefetch = 0 : i64, scratch_operands = 0 : i64, tpu.core_type = #tpu.core_type<tc>, window_params = [{pipeline_mode = #tpu.pipeline_mode<synchronous>, transform_indices = @transform_0, window_bounds = array<i64: 1024, 128>}, {pipeline_mode = #tpu.pipeline_mode<synchronous>, transform_indices = @transform_1, window_bounds = array<i64: 8, 128>}, {transform_indices = @transform_2, window_bounds = array<i64: 8, 16>}, {transform_indices = @transform_3, window_bounds = array<i64: 8, 8>}, {transform_indices = @transform_4, window_bounds = array<i64: 8, 128>}]} {
    %c0 = arith.constant 0 : index
    %c0_0 = arith.constant 0 : index
    %0 = vector.load %arg3[%c0, %c0_0] : memref<8x16xf32, #tpu.memory_space<vmem>>, vector<8x16xf32>
    %1 = arith.truncf %0 : vector<8x16xf32> to vector<8x16xbf16>
    %c0_1 = arith.constant 0 : index
    %c0_2 = arith.constant 0 : index
    %2 = vector.load %arg1[%c0_1, %c0_2] : memref<1024x128xbf16, #tpu.memory_space<vmem>>, vector<16x128xbf16>
    %cst = arith.constant dense<0.000000e+00> : vector<8x128xf32>
    %3 = tpu.matmul %1, %2, %cst {dimension_numbers = #tpu.dot_dimension_numbers<[1], [0], [0], [1], [0, 0, 1, 1], [], []>} : vector<8x16xbf16>, vector<16x128xbf16>, vector<8x128xf32> -> vector<8x128xf32>
    %c0_3 = arith.constant 0 : index
    %c0_4 = arith.constant 0 : index
    %4 = vector.load %arg2[%c0_3, %c0_4] : memref<8x128xf32, #tpu.memory_space<vmem>>, vector<1x128xf32>
    %5 = vector.broadcast %4 : vector<1x128xf32> to vector<8x128xf32>
    %6 = arith.addf %3, %5 : vector<8x128xf32>
    %7 = math.tanh %6 : vector<8x128xf32>
    %8 = arith.truncf %7 : vector<8x128xf32> to vector<8x128xbf16>
    %c128 = arith.constant 128 : index
    %c0_5 = arith.constant 0 : index
    %9 = vector.load %arg1[%c128, %c0_5] : memref<1024x128xbf16, #tpu.memory_space<vmem>>, vector<128x128xbf16>
    %cst_6 = arith.constant dense<0.000000e+00> : vector<8x128xf32>
    %10 = tpu.matmul %8, %9, %cst_6 {dimension_numbers = #tpu.dot_dimension_numbers<[1], [0], [0], [1], [0, 0, 1, 1], [], []>} : vector<8x128xbf16>, vector<128x128xbf16>, vector<8x128xf32> -> vector<8x128xf32>
    %c1 = arith.constant 1 : index
    %c0_7 = arith.constant 0 : index
    %11 = vector.load %arg2[%c1, %c0_7] : memref<8x128xf32, #tpu.memory_space<vmem>>, vector<1x128xf32>
    %12 = vector.broadcast %11 : vector<1x128xf32> to vector<8x128xf32>
    %13 = arith.addf %10, %12 : vector<8x128xf32>
    %14 = math.tanh %13 : vector<8x128xf32>
    %15 = arith.truncf %14 : vector<8x128xf32> to vector<8x128xbf16>
    %c256 = arith.constant 256 : index
    %c0_8 = arith.constant 0 : index
    %16 = vector.load %arg1[%c256, %c0_8] : memref<1024x128xbf16, #tpu.memory_space<vmem>>, vector<128x128xbf16>
    %cst_9 = arith.constant dense<0.000000e+00> : vector<8x128xf32>
    %17 = tpu.matmul %15, %16, %cst_9 {dimension_numbers = #tpu.dot_dimension_numbers<[1], [0], [0], [1], [0, 0, 1, 1], [], []>} : vector<8x128xbf16>, vector<128x128xbf16>, vector<8x128xf32> -> vector<8x128xf32>
    %c2 = arith.constant 2 : index
    %c0_10 = arith.constant 0 : index
    %18 = vector.load %arg2[%c2, %c0_10] : memref<8x128xf32, #tpu.memory_space<vmem>>, vector<1x128xf32>
    %19 = vector.broadcast %18 : vector<1x128xf32> to vector<8x128xf32>
    %20 = arith.addf %17, %19 : vector<8x128xf32>
    %21 = math.tanh %20 : vector<8x128xf32>
    %22 = arith.truncf %21 : vector<8x128xf32> to vector<8x128xbf16>
    %c384 = arith.constant 384 : index
    %c0_11 = arith.constant 0 : index
    %23 = vector.load %arg1[%c384, %c0_11] : memref<1024x128xbf16, #tpu.memory_space<vmem>>, vector<128x128xbf16>
    %cst_12 = arith.constant dense<0.000000e+00> : vector<8x128xf32>
    %24 = tpu.matmul %22, %23, %cst_12 {dimension_numbers = #tpu.dot_dimension_numbers<[1], [0], [0], [1], [0, 0, 1, 1], [], []>} : vector<8x128xbf16>, vector<128x128xbf16>, vector<8x128xf32> -> vector<8x128xf32>
    %c3 = arith.constant 3 : index
    %c0_13 = arith.constant 0 : index
    %25 = vector.load %arg2[%c3, %c0_13] : memref<8x128xf32, #tpu.memory_space<vmem>>, vector<1x128xf32>
    %26 = vector.broadcast %25 : vector<1x128xf32> to vector<8x128xf32>
    %27 = arith.addf %24, %26 : vector<8x128xf32>
    %28 = tpu.iota {dimensions = array<i32: 1>} : vector<8x128xi32>
    %c4_i32 = arith.constant 4 : i32
    %29 = vector.broadcast %c4_i32 : i32 to vector<8x128xi32>
    %30 = arith.cmpi slt, %28, %29 : vector<8x128xi32>
    %cst_14 = arith.constant 0.000000e+00 : f32
    %31 = vector.broadcast %cst_14 : f32 to vector<8x128xf32>
    %32 = arith.select %30, %27, %31 : vector<8x128xi1>, vector<8x128xf32>
    %c4_i32_15 = arith.constant 4 : i32
    %33 = vector.broadcast %c4_i32_15 : i32 to vector<8x128xi32>
    %34 = arith.cmpi sge, %28, %33 : vector<8x128xi32>
    %c8_i32 = arith.constant 8 : i32
    %35 = vector.broadcast %c8_i32 : i32 to vector<8x128xi32>
    %36 = arith.cmpi slt, %28, %35 : vector<8x128xi32>
    %37 = arith.andi %34, %36 : vector<8x128xi1>
    %cst_16 = arith.constant 0.000000e+00 : f32
    %38 = vector.broadcast %cst_16 : f32 to vector<8x128xf32>
    %39 = arith.select %37, %27, %38 : vector<8x128xi1>, vector<8x128xf32>
    %c0_17 = arith.constant 0 : index
    %c0_18 = arith.constant 0 : index
    %40 = vector.load %arg4[%c0_17, %c0_18] : memref<8x8xf32, #tpu.memory_space<vmem>>, vector<8x8xf32>
    %c0_i32 = arith.constant 0 : i32
    %41 = arith.sitofp %c0_i32 : i32 to f32
    %42 = vector.broadcast %41 : f32 to vector<8x120xf32>
    %43 = tpu.concatenate %40, %42 in 1 : vector<8x8xf32>, vector<8x120xf32> -> vector<8x128xf32>
    %44 = math.exp %39 : vector<8x128xf32>
    %45 = arith.mulf %43, %44 : vector<8x128xf32>
    %46 = arith.addf %32, %45 : vector<8x128xf32>
    %47 = arith.truncf %46 : vector<8x128xf32> to vector<8x128xbf16>
    %c512 = arith.constant 512 : index
    %c0_19 = arith.constant 0 : index
    %48 = vector.load %arg1[%c512, %c0_19] : memref<1024x128xbf16, #tpu.memory_space<vmem>>, vector<128x128xbf16>
    %cst_20 = arith.constant dense<0.000000e+00> : vector<8x128xf32>
    %49 = tpu.matmul %47, %48, %cst_20 {dimension_numbers = #tpu.dot_dimension_numbers<[1], [0], [0], [1], [0, 0, 1, 1], [], []>} : vector<8x128xbf16>, vector<128x128xbf16>, vector<8x128xf32> -> vector<8x128xf32>
    %c4 = arith.constant 4 : index
    %c0_21 = arith.constant 0 : index
    %50 = vector.load %arg2[%c4, %c0_21] : memref<8x128xf32, #tpu.memory_space<vmem>>, vector<1x128xf32>
    %51 = vector.broadcast %50 : vector<1x128xf32> to vector<8x128xf32>
    %52 = arith.addf %49, %51 : vector<8x128xf32>
    %53 = math.tanh %52 : vector<8x128xf32>
    %54 = arith.truncf %53 : vector<8x128xf32> to vector<8x128xbf16>
    %c640 = arith.constant 640 : index
    %c0_22 = arith.constant 0 : index
    %55 = vector.load %arg1[%c640, %c0_22] : memref<1024x128xbf16, #tpu.memory_space<vmem>>, vector<128x128xbf16>
    %cst_23 = arith.constant dense<0.000000e+00> : vector<8x128xf32>
    %56 = tpu.matmul %54, %55, %cst_23 {dimension_numbers = #tpu.dot_dimension_numbers<[1], [0], [0], [1], [0, 0, 1, 1], [], []>} : vector<8x128xbf16>, vector<128x128xbf16>, vector<8x128xf32> -> vector<8x128xf32>
    %c5 = arith.constant 5 : index
    %c0_24 = arith.constant 0 : index
    %57 = vector.load %arg2[%c5, %c0_24] : memref<8x128xf32, #tpu.memory_space<vmem>>, vector<1x128xf32>
    %58 = vector.broadcast %57 : vector<1x128xf32> to vector<8x128xf32>
    %59 = arith.addf %56, %58 : vector<8x128xf32>
    %60 = math.tanh %59 : vector<8x128xf32>
    %61 = arith.truncf %60 : vector<8x128xf32> to vector<8x128xbf16>
    %c768 = arith.constant 768 : index
    %c0_25 = arith.constant 0 : index
    %62 = vector.load %arg1[%c768, %c0_25] : memref<1024x128xbf16, #tpu.memory_space<vmem>>, vector<128x128xbf16>
    %cst_26 = arith.constant dense<0.000000e+00> : vector<8x128xf32>
    %63 = tpu.matmul %61, %62, %cst_26 {dimension_numbers = #tpu.dot_dimension_numbers<[1], [0], [0], [1], [0, 0, 1, 1], [], []>} : vector<8x128xbf16>, vector<128x128xbf16>, vector<8x128xf32> -> vector<8x128xf32>
    %c6 = arith.constant 6 : index
    %c0_27 = arith.constant 0 : index
    %64 = vector.load %arg2[%c6, %c0_27] : memref<8x128xf32, #tpu.memory_space<vmem>>, vector<1x128xf32>
    %65 = vector.broadcast %64 : vector<1x128xf32> to vector<8x128xf32>
    %66 = arith.addf %63, %65 : vector<8x128xf32>
    %67 = math.tanh %66 : vector<8x128xf32>
    %68 = arith.truncf %67 : vector<8x128xf32> to vector<8x128xbf16>
    %c896 = arith.constant 896 : index
    %c0_28 = arith.constant 0 : index
    %69 = vector.load %arg1[%c896, %c0_28] : memref<1024x128xbf16, #tpu.memory_space<vmem>>, vector<128x128xbf16>
    %cst_29 = arith.constant dense<0.000000e+00> : vector<8x128xf32>
    %70 = tpu.matmul %68, %69, %cst_29 {dimension_numbers = #tpu.dot_dimension_numbers<[1], [0], [0], [1], [0, 0, 1, 1], [], []>} : vector<8x128xbf16>, vector<128x128xbf16>, vector<8x128xf32> -> vector<8x128xf32>
    %c7 = arith.constant 7 : index
    %c0_30 = arith.constant 0 : index
    %71 = vector.load %arg2[%c7, %c0_30] : memref<8x128xf32, #tpu.memory_space<vmem>>, vector<1x128xf32>
    %72 = vector.broadcast %71 : vector<1x128xf32> to vector<8x128xf32>
    %73 = arith.addf %70, %72 : vector<8x128xf32>
    %74 = arith.addf %73, %27 : vector<8x128xf32>
    %c0_31 = arith.constant 0 : index
    %c0_32 = arith.constant 0 : index
    %75 = vector.load %arg5[%c0_31, %c0_32] : memref<8x128xf32, #tpu.memory_space<vmem>>, vector<8x128xf32>
    tpu.vector_store %arg5[%c0_31, %c0_32], %74 {strides = array<i32>} : memref<8x128xf32, #tpu.memory_space<vmem>>, vector<8x128xf32>,
    return
  }
  func.func @transform_0(%arg0: i32) -> (i32, i32) {
    %c0_i32 = arith.constant 0 : i32
    %c0_i32_0 = arith.constant 0 : i32
    %c0_i32_1 = arith.constant 0 : i32
    return %c0_i32, %c0_i32_0 : i32, i32
  }
  func.func @transform_1(%arg0: i32) -> (i32, i32) {
    %c0_i32 = arith.constant 0 : i32
    %c0_i32_0 = arith.constant 0 : i32
    %c0_i32_1 = arith.constant 0 : i32
    return %c0_i32, %c0_i32_0 : i32, i32
  }
  func.func @transform_2(%arg0: i32) -> (i32, i32) {
    %c0_i32 = arith.constant 0 : i32
    %c0_i32_0 = arith.constant 0 : i32
    return %arg0, %c0_i32 : i32, i32
  }
  func.func @transform_3(%arg0: i32) -> (i32, i32) {
    %c0_i32 = arith.constant 0 : i32
    %c0_i32_0 = arith.constant 0 : i32
    return %arg0, %c0_i32 : i32, i32
  }
  func.func @transform_4(%arg0: i32) -> (i32, i32) {
    %c0_i32 = arith.constant 0 : i32
    %c0_i32_0 = arith.constant 0 : i32
    return %arg0, %c0_i32 : i32, i32
  }
}

</mosaic_0001>

<bundles_post_ra>
// kernel: vae_forward.1
= control target key start
LH: loop header
LB: loop body
LE: loop exit
PB: predicated region body
PF: predicated region fallthrough
CT: control target
= control target key end

     0   :  { %9 = vsyncpa [#allocation3], 0  ;;  %s988_s18 = smov [#allocation2]   ;;  %s989_s20 = smov 64   ;;  %s1057_s0 = inlined_call_operand.hbm [shape: bf16[1024,128], index: 0, kind: input, shape index: {}]   ;;  %s1058_s1 = inlined_call_operand.vmem [shape: f32[8,128], index: 1, kind: input, shape index: {}]   ;;  %s1059_s2 = inlined_call_operand.vmem [shape: f32[8,16], index: 2, kind: input, shape index: {}]   ;;  %s1060_s3 = inlined_call_operand.vmem [shape: f32[8,8], index: 3, kind: input, shape index: {}]   ;;  %s1061_s4 = inlined_call_operand.vmem [shape: f32[8,128], index: 4, kind: output, shape index: {}]  }
   0x1   :  { %s14_s17 = sshll.u32 %s1057_s0, 4  ;;  %s16_s19 = sshll.u32 %s988_s18, 4  ;;  %s15_s17 = int_to_ptr.hbm [resolvable:$true] %s14_s17  ;;  %s17_s19 = int_to_ptr.vmem [resolvable:$true] %s16_s19 }
   0x2   :  { %s990_s21 = smov 4  }
   0x3   :  { %22 = dma.hbm_to_vmem [thread:$0]  %s15_s17, 8192, %s17_s19, [#allocation3], %s989_s20, %s989_s20, %s990_s21  }
   0x4   :  { %986 = dma.done.wait [#allocation3], 8192  }
   0x5   :  { %987 = vsyncadd [#allocation3], 4294959104  ;;  %v880_v0 = vld [vmem:[#allocation2] sm:$0xff]  ;;  %v888_v2 = vld [vmem:[#allocation2 + $0x78] sm:$0xff]  ;;  %vm46_vm0 = vcmask 130048   ;;  %v306_v54 = vlaneseq  ;;  %vm315_vm4 = vcmask 64512  }
   0x6   :  { %v34_v1 = vld [vmem:[%s1059_s2] sm:$0xff]  ;;  %57 = vmatpush.bf16.msra.mxu0 %v880_v0  ;;  %131 = vmatpush.bf16.msra.mxu1 %v888_v2  ;;  %v887_v4 = vld [vmem:[#allocation2 + $0x70] sm:$0xff]  ;;  %v886_v5 = vld [vmem:[#allocation2 + $0x68] sm:$0xff] }
   0x7   :  { %v35_v3 = vpack.c.bf16 %v34_v1, %v34_v1  ;;  %v885_v6 = vld [vmem:[#allocation2 + $0x60] sm:$0xff]  ;;  %v884_v7 = vld [vmem:[#allocation2 + $0x58] sm:$0xff]  ;;  %v883_v8 = vld [vmem:[#allocation2 + $0x50] sm:$0xff]  ;;  %v307_v56 = vand.u32 127, %v306_v54 }
   0x8   :  { %v882_v9 = vld [vmem:[#allocation2 + $0x48] sm:$0xff]  ;;  %v881_v10 = vld [vmem:[#allocation2 + $0x40] sm:$0xff]  ;;  %v896_v11 = vld [vmem:[#allocation2 + $0xb8] sm:$0xff] }
   0x9   :  { %655 = vmatmul.msk.bf16.vlgmr.msra.gmra.mxu0 %vm46_vm0, %v35_v3  ;;  %212 = vmatpush.bf16.msra.mxu2 %v896_v11  ;;  %v895_v12 = vld [vmem:[#allocation2 + $0xb0] sm:$0xff]  ;;  %v894_v13 = vld [vmem:[#allocation2 + $0xa8] sm:$0xff]  ;;  %v893_v14 = vld [vmem:[#allocation2 + $0xa0] sm:$0xff]  ;;  %vm310_vm1 = vcmp.ge.s32.totalorder %v307_v56, 4  ;;  %vm311_vm2 = vcmp.lt.s32.totalorder %v307_v56, 8  ;;  %vm308_vm5 = vcmp.lt.s32.totalorder %v307_v56, 4 }
   0xa   :  { %132 = vmatpush.bf16.msra.mxu1 %v887_v4  ;;  %v892_v15 = vld [vmem:[#allocation2 + $0x98] sm:$0xff]  ;;  %v940_v16 = vld [vmem:[%s1058_s1] ss:$0 sm:$0xff]  ;;  %v891_v22 = vld [vmem:[#allocation2 + $0x90] sm:$0xff] }
   0xb   :  { %v890_v23 = vld [vmem:[#allocation2 + $0x88] sm:$0xff]  ;;  %v889_v24 = vld [vmem:[#allocation2 + $0x80] sm:$0xff]  ;;  %v904_v25 = vld [vmem:[#allocation2 + $0xf8] sm:$0xff] }
   0xc   :  { %293 = vmatpush.bf16.msra.mxu3 %v904_v25  ;;  %v903_v26 = vld [vmem:[#allocation2 + $0xf0] sm:$0xff]  ;;  %v902_v27 = vld [vmem:[#allocation2 + $0xe8] sm:$0xff]  ;;  %v901_v28 = vld [vmem:[#allocation2 + $0xe0] sm:$0xff] }
   0xd   :  { %213 = vmatpush.bf16.msra.mxu2 %v895_v12  ;;  %v900_v29 = vld [vmem:[#allocation2 + $0xd8] sm:$0xff]  ;;  %v941_v30 = vld [vmem:[%s1058_s1 + $0x1] ss:$0 sm:$0xff]  ;;  %v899_v36 = vld [vmem:[#allocation2 + $0xd0] sm:$0xff] }
   0xe   :  { %133 = vmatpush.bf16.msra.mxu1 %v886_v5  ;;  %v898_v37 = vld [vmem:[#allocation2 + $0xc8] sm:$0xff]  ;;  %v897_v38 = vld [vmem:[#allocation2 + $0xc0] sm:$0xff]  ;;  %v912_v39 = vld [vmem:[#allocation2 + $0x138] sm:$0xff] }
   0xf   :  { %388 = vmatpush.bf16.msrb.mxu0 %v912_v39  ;;  %v911_v40 = vld [vmem:[#allocation2 + $0x130] sm:$0xff]  ;;  %v910_v41 = vld [vmem:[#allocation2 + $0x128] sm:$0xff]  ;;  %v942_v42 = vld [vmem:[%s1058_s1 + $0x2] ss:$0 sm:$0xff] }
  0x10   :  { %294 = vmatpush.bf16.msra.mxu3 %v903_v26  ;;  %v909_v48 = vld [vmem:[#allocation2 + $0x120] sm:$0xff]  ;;  %v908_v49 = vld [vmem:[#allocation2 + $0x118] sm:$0xff]  ;;  %v907_v50 = vld [vmem:[#allocation2 + $0x110] sm:$0xff] }
  0x11   :  { %214 = vmatpush.bf16.msra.mxu2 %v894_v13  ;;  %v906_v51 = vld [vmem:[#allocation2 + $0x108] sm:$0xff]  ;;  %v905_v52 = vld [vmem:[#allocation2 + $0x100] sm:$0xff]  ;;  %v920_v53 = vld [vmem:[#allocation2 + $0x178] sm:$0xff] }
  0x12   :  { %134 = vmatpush.bf16.msra.mxu1 %v885_v6  ;;  %v919_v55 = vld [vmem:[#allocation2 + $0x170] sm:$0xff]  ;;  %v918_v57 = vld [vmem:[#allocation2 + $0x168] sm:$0xff]  ;;  %v943_v58 = vld [vmem:[%s1058_s1 + $0x3] ss:$0 sm:$0xff] }
  0x13   :  { %389 = vmatpush.bf16.msrb.mxu0 %v911_v40  ;;  %v917_v59 = vld [vmem:[#allocation2 + $0x160] sm:$0xff]  ;;  %vm312_vm3 = vmand %vm310_vm1, %vm311_vm2  ;;  %v916_v62 = vld [vmem:[#allocation2 + $0x158] sm:$0xff] }
  0x14   :  { %295 = vmatpush.bf16.msra.mxu3 %v902_v27  ;;  %v314_v1 = vld [vmem:[%s1060_s3] sm:$0xff]  ;;  %v928_v12 = vld [vmem:[#allocation2 + $0x1b8] sm:$0xff]  ;;  %v927_v13 = vld [vmem:[#allocation2 + $0x1b0] sm:$0xff] }
  0x15   :  { %215 = vmatpush.bf16.msra.mxu2 %v893_v14  ;;  %v316_v3 = vsel %vm315_vm4, %v314_v1, 0.0  ;;  %v913_v11 = vld [vmem:[#allocation2 + $0x140] sm:$0xff]  ;;  %v926_v14 = vld [vmem:[#allocation2 + $0x1a8] sm:$0xff]  ;;  %v936_v26 = vld [vmem:[#allocation2 + $0x1f8] sm:$0xff] }
  0x16   :  { %135 = vmatpush.bf16.msra.mxu1 %v884_v7  ;;  %v921_v25 = vld [vmem:[#allocation2 + $0x180] sm:$0xff]  ;;  %v935_v27 = vld [vmem:[#allocation2 + $0x1f0] sm:$0xff] }
  0x17   :  { %390 = vmatpush.bf16.msrb.mxu0 %v910_v41  ;;  %v929_v39 = vld [vmem:[#allocation2 + $0x1c0] sm:$0xff] }
  0x18   :  { %296 = vmatpush.bf16.msra.mxu3 %v901_v28  ;;  %v934_v28 = vld [vmem:[#allocation2 + $0x1e8] sm:$0xff]  ;;  %v946_v40 = vld [vmem:[%s1058_s1 + $0x6] ss:$0 sm:$0xff] }
  0x19   :  { %216 = vmatpush.bf16.msra.mxu2 %v892_v15  ;;  %v925_v15 = vld [vmem:[#allocation2 + $0x1a0] sm:$0xff] }
  0x1a   :  { %136 = vmatpush.bf16.msra.mxu1 %v883_v8 }
  0x1b   :  { %391 = vmatpush.bf16.msrb.mxu0 %v909_v48 }
  0x1c   :  { %297 = vmatpush.bf16.msra.mxu3 %v900_v29  ;;  %v933_v29 = vld [vmem:[#allocation2 + $0x1e0] sm:$0xff] }
  0x1d   :  { %217 = vmatpush.bf16.msra.mxu2 %v891_v22 }
  0x1e   :  { %137 = vmatpush.bf16.msra.mxu1 %v882_v9  ;;  %v915_v9 = vld [vmem:[#allocation2 + $0x150] sm:$0xff] }
  0x1f   :  { %392 = vmatpush.bf16.msrb.mxu0 %v908_v49 }
  0x20   :  { %298 = vmatpush.bf16.msra.mxu3 %v899_v36 }
  0x21   :  { %218 = vmatpush.bf16.msra.mxu2 %v890_v23  ;;  %v923_v23 = vld [vmem:[#allocation2 + $0x190] sm:$0xff] }
  0x22   :  { %138 = vmatpush.bf16.msra.mxu1 %v881_v10  ;;  %v914_v10 = vld [vmem:[#allocation2 + $0x148] sm:$0xff] }
  0x23   :  { %393 = vmatpush.bf16.msrb.mxu0 %v907_v50 }
  0x24   :  { %299 = vmatpush.bf16.msra.mxu3 %v898_v37  ;;  %v931_v37 = vld [vmem:[#allocation2 + $0x1d0] sm:$0xff] }
  0x25   :  { %219 = vmatpush.bf16.msra.mxu2 %v889_v24  ;;  %v922_v24 = vld [vmem:[#allocation2 + $0x188] sm:$0xff] }
  0x26   :  { %469 = vmatpush.bf16.msrb.mxu1 %v920_v53 }
  0x27   :  { %394 = vmatpush.bf16.msrb.mxu0 %v906_v51 }
  0x28   :  { %300 = vmatpush.bf16.msra.mxu3 %v897_v38  ;;  %v930_v38 = vld [vmem:[#allocation2 + $0x1c8] sm:$0xff] }
  0x29   :  { %550 = vmatpush.bf16.msrb.mxu2 %v928_v12 }
  0x2a   :  { %470 = vmatpush.bf16.msrb.mxu1 %v919_v55 }
  0x2b   :  { %395 = vmatpush.bf16.msrb.mxu0 %v905_v52 }
  0x2c   :  { %631 = vmatpush.bf16.msrb.mxu3 %v936_v26 }
  0x2d   :  { %551 = vmatpush.bf16.msrb.mxu2 %v927_v13 }
  0x2e   :  { %471 = vmatpush.bf16.msrb.mxu1 %v918_v57 }
  0x30   :  { %632 = vmatpush.bf16.msrb.mxu3 %v935_v27 }
  0x31   :  { %552 = vmatpush.bf16.msrb.mxu2 %v926_v14 }
  0x32   :  { %472 = vmatpush.bf16.msrb.mxu1 %v917_v59 }
  0x34   :  { %633 = vmatpush.bf16.msrb.mxu3 %v934_v28 }
  0x35   :  { %553 = vmatpush.bf16.msrb.mxu2 %v925_v15 }
  0x36   :  { %473 = vmatpush.bf16.msrb.mxu1 %v916_v62 }
  0x38   :  { %634 = vmatpush.bf16.msrb.mxu3 %v933_v29 }
  0x3a   :  { %474 = vmatpush.bf16.msrb.mxu1 %v915_v9 }
  0x3e   :  { %475 = vmatpush.bf16.msrb.mxu1 %v914_v10 }
  0x42   :  { %476 = vmatpush.bf16.msrb.mxu1 %v913_v11 }
  0x86   :  { %v59_v17 = vpop.f32.mrf.mxu0 }
  0x87   :  { %v60_v18 = vadd.f32 %v940_v16, %v59_v17  ;;  %v924_v16 = vld [vmem:[#allocation2 + $0x198] sm:$0xff]  ;;  %v944_v17 = vld [vmem:[%s1058_s1 + $0x4] ss:$0 sm:$0xff] }
  0x88   :  { %554 = vmatpush.bf16.msrb.mxu2 %v924_v16 }
  0x89   :  { %948 = vtanh.f32 %v60_v18 }
  0x8c   :  { %555 = vmatpush.bf16.msrb.mxu2 %v923_v23 }
  0x8e   :  { %v61_v19 = vpop.f32.mrf.mxu0 }
  0x8f   :  { %v949_v20 = vpop.eup %948 }
  0x90   :  { %v64_v21 = vpack.c.bf16 %v949_v20, %v949_v20  ;;  %556 = vmatpush.bf16.msrb.mxu2 %v922_v24 }
  0x92   :  { %139 = vmatmul.bf16.vlgmr.msra.gmra.mxu1 %v64_v21 }
  0x94   :  { %557 = vmatpush.bf16.msrb.mxu2 %v921_v25 }
 0x10f   :  { %v140_v31 = vpop.f32.mrf.mxu1 }
 0x110   :  { %v141_v32 = vadd.f32 %v941_v30, %v140_v31  ;;  %v932_v30 = vld [vmem:[#allocation2 + $0x1d8] sm:$0xff]  ;;  %v945_v31 = vld [vmem:[%s1058_s1 + $0x5] ss:$0 sm:$0xff] }
 0x111   :  { %635 = vmatpush.bf16.msrb.mxu3 %v932_v30 }
 0x112   :  { %950 = vtanh.f32 %v141_v32 }
 0x115   :  { %636 = vmatpush.bf16.msrb.mxu3 %v931_v37 }
 0x117   :  { %v142_v33 = vpop.f32.mrf.mxu1 }
 0x118   :  { %v951_v34 = vpop.eup %950 }
 0x119   :  { %v145_v35 = vpack.c.bf16 %v951_v34, %v951_v34  ;;  %637 = vmatpush.bf16.msrb.mxu3 %v930_v38 }
 0x11b   :  { %220 = vmatmul.bf16.vlgmr.msra.gmra.mxu2 %v145_v35 }
 0x11d   :  { %638 = vmatpush.bf16.msrb.mxu3 %v929_v39 }
 0x19e   :  { %v221_v43 = vpop.f32.mrf.mxu2 }
 0x19f   :  { %v222_v44 = vadd.f32 %v942_v42, %v221_v43 }
 0x1a1   :  { %952 = vtanh.f32 %v222_v44 }
 0x1a6   :  { %v223_v45 = vpop.f32.mrf.mxu2 }
 0x1a7   :  { %v953_v46 = vpop.eup %952 }
 0x1a8   :  { %v226_v47 = vpack.c.bf16 %v953_v46, %v953_v46  ;;  %v947_v46 = vld [vmem:[%s1058_s1 + $0x7] ss:$0 sm:$0xff] }
 0x1aa   :  { %301 = vmatmul.bf16.vlgmr.msra.gmra.mxu3 %v226_v47 }
 0x22d   :  { %v302_v60 = vpop.f32.mrf.mxu3 }
 0x22e   :  { %v1034_v61 = vadd.f32 %v943_v58, %v302_v60 }
 0x230   :  { %v313_v63 = vsel %vm312_vm3, %v1034_v61, 0.0  ;;  %v309_v6 = vsel %vm308_vm5, %v1034_v61, 0.0 }
 0x231   :  { %v317_v0 = vmul.f32 1.442695, %v313_v63 }
 0x233   :  { %954 = vpow2.f32 %v317_v0 }
 0x235   :  { %v304_v2 = vpop.f32.mrf.mxu3 }
 0x239   :  { %v955_v4 = vpop.eup %954 }
 0x23a   :  { %v319_v5 = vmul.f32 %v955_v4, %v316_v3 }
 0x23c   :  { %v320_v7 = vadd.f32 %v319_v5, %v309_v6 }
 0x23e   :  { %v321_v8 = vpack.c.bf16 %v320_v7, %v320_v7 }
 0x240   :  { %396 = vmatmul.bf16.vlgmr.msrb.gmra.mxu0 %v321_v8 }
 0x2bd   :  { %v397_v18 = vpop.f32.mrf.mxu0 }
 0x2be   :  { %v398_v19 = vadd.f32 %v944_v17, %v397_v18 }
 0x2c0   :  { %956 = vtanh.f32 %v398_v19 }
 0x2c5   :  { %v399_v20 = vpop.f32.mrf.mxu0 }
 0x2c6   :  { %v957_v21 = vpop.eup %956 }
 0x2c7   :  { %v402_v22 = vpack.c.bf16 %v957_v21, %v957_v21 }
 0x2c9   :  { %477 = vmatmul.bf16.vlgmr.msrb.gmra.mxu1 %v402_v22 }
 0x346   :  { %v478_v32 = vpop.f32.mrf.mxu1 }
 0x347   :  { %v479_v33 = vadd.f32 %v945_v31, %v478_v32 }
 0x349   :  { %958 = vtanh.f32 %v479_v33 }
 0x34e   :  { %v480_v34 = vpop.f32.mrf.mxu1 }
 0x34f   :  { %v959_v35 = vpop.eup %958 }
 0x350   :  { %v483_v36 = vpack.c.bf16 %v959_v35, %v959_v35 }
 0x352   :  { %558 = vmatmul.bf16.vlgmr.msrb.gmra.mxu2 %v483_v36 }
 0x3d5   :  { %v559_v41 = vpop.f32.mrf.mxu2 }
 0x3d6   :  { %v560_v42 = vadd.f32 %v946_v40, %v559_v41 }
 0x3d8   :  { %960 = vtanh.f32 %v560_v42 }
 0x3dd   :  { %v561_v43 = vpop.f32.mrf.mxu2 }
 0x3de   :  { %v961_v44 = vpop.eup %960 }
 0x3df   :  { %v564_v45 = vpack.c.bf16 %v961_v44, %v961_v44 }
 0x3e1   :  { %639 = vmatmul.bf16.vlgmr.msrb.gmra.mxu3 %v564_v45 }
 0x464   :  { %v640_v47 = vpop.f32.mrf.mxu3 }
 0x465   :  { %v641_v48 = vadd.f32 %v947_v46, %v640_v47 }
 0x467   :  { %v644_v49 = vadd.f32 %v641_v48, %v1034_v61 }
 0x469   :  { %645 = vst [vmem:[%s1061_s4] sm:$0xff] %v644_v49 }
 0x46c   :  { %v642_v50 = vpop.f32.mrf.mxu3 }
 0x46d   :  { %650 = vsyncpa [#allocation3], 1 }

</bundles_post_ra>
